<compile_context>
chip_gen: v7x
topology: tpu7x:2x2x1
jax: 0.10.0
libtpu: 0.0.40
codegen_flags: <defaults>
</compile_context>

<pallas_src>
import math

import jax
import jax.numpy as jnp
from jax.experimental import pallas as pl
from jax.experimental.pallas import tpu as pltpu


def positional_encoding_kernel(x_ref, pe_ref, o_ref):
    # x_ref: (tile_t, B, D); pe_ref: (tile_t, 1, D) -> broadcast over the batch
    # (sublane) dim by the VPU add.  Dropout is identity at inference.
    # TODO(synk): training-mode dropout (stochastic masking) not applied; would
    # need pltpu.prng_seed/prng_random_bits if ever required.
    o_ref[...] = x_ref[...] + pe_ref[...]


def make_sinusoidal_pe(block_size, d_model, dtype=jnp.float32):
    """Pure-JAX construction of the registered `pe` buffer: (block_size, 1, d_model)."""
    position = jnp.arange(block_size, dtype=jnp.float32)[:, None]            # (S, 1)
    div_term = jnp.exp(jnp.arange(0, d_model, 2, dtype=jnp.float32)
                       * (-math.log(10000.0) / d_model))                     # (D/2,)
    angles = position * div_term                                             # (S, D/2)
    pe = jnp.zeros((block_size, d_model), dtype=jnp.float32)
    pe = pe.at[:, 0::2].set(jnp.sin(angles))
    pe = pe.at[:, 1::2].set(jnp.cos(angles[:, : d_model // 2]))
    return pe[:, None, :].astype(dtype)                                      # (S, 1, D)


def positional_encoding_forward(x, pe, *, vmem_budget_bytes=4 * 1024 * 1024):
    """x: (T, B, D) float32.  pe: (block_size, 1, D) with block_size >= T."""
    T, B, D = x.shape
    pe_t = pe[:T]                                                            # (T, 1, D)

    # Largest seq tile that divides T and keeps a double-buffered x block
    # under the VMEM budget.  Tiny inputs collapse to a single grid step.
    bytes_per_row = 2 * B * D * x.dtype.itemsize        # x block, double-buffered
    tile_t = max(1, min(T, vmem_budget_bytes // max(bytes_per_row, 1)))
    while T % tile_t:
        tile_t -= 1
    grid = (T // tile_t,)

    return pl.pallas_call(
        positional_encoding_kernel,
        out_shape=jax.ShapeDtypeStruct((T, B, D), x.dtype),
        grid_spec=pltpu.PrefetchScalarGridSpec(
            num_scalar_prefetch=0,
            grid=grid,
            in_specs=[
                pl.BlockSpec((tile_t, B, D), lambda t: (t, 0, 0)),   # x
                pl.BlockSpec((tile_t, 1, D), lambda t: (t, 0, 0)),   # pe[:T]
            ],
            out_specs=pl.BlockSpec((tile_t, B, D), lambda t: (t, 0, 0)),
        ),
        compiler_params=pltpu.CompilerParams(
            dimension_semantics=("parallel",)),
    )(x, pe_t)


def positional_encoding_reference(x, pe):
    """Pure-JAX reference mirroring the PyTorch forward (eval mode)."""
    T = x.shape[0]
    return x + pe[:T]


if __name__ == "__main__":
    # small shapes consistent with the module; d_model kept a multiple of 128
    # so the output last dim is lane-dense.
    seq_len, batch, d_model = 8, 4, 128
    block_size = 16                      # pe buffer length, seq_len <= block_size

    key = jax.random.PRNGKey(0)
    x = jax.random.normal(key, (seq_len, batch, d_model), dtype=jnp.float32)
    pe = make_sinusoidal_pe(block_size, d_model)

    out = positional_encoding_forward(x, pe)
    out = jax.block_until_ready(out)

    ref = positional_encoding_reference(x, pe)
    assert out.shape == (seq_len, batch, d_model)
    assert jnp.allclose(out, ref, atol=1e-6, rtol=1e-6), "mismatch vs reference"

    print("KERNEL_OK")
</pallas_src>

<mosaic_0001>
module attributes {stable_mosaic.version = 11 : i64} {
  func.func @positional_encoding_kernel(%arg0: i32, %arg1: memref<8x4x128xf32, #tpu.memory_space<vmem>>, %arg2: memref<8x1x128xf32, #tpu.memory_space<vmem>>, %arg3: memref<8x4x128xf32, #tpu.memory_space<vmem>>) attributes {dimension_semantics = [#tpu.dimension_semantics<parallel>], iteration_bounds = array<i64: 1>, scalar_prefetch = 0 : i64, scratch_operands = 0 : i64, tpu.core_type = #tpu.core_type<tc>, window_params = [{transform_indices = @transform_0, window_bounds = array<i64: 8, 4, 128>}, {transform_indices = @transform_1, window_bounds = array<i64: 8, 1, 128>}, {transform_indices = @transform_2, window_bounds = array<i64: 8, 4, 128>}]} {
    %c0 = arith.constant 0 : index
    %c0_0 = arith.constant 0 : index
    %c0_1 = arith.constant 0 : index
    %0 = vector.load %arg1[%c0, %c0_0, %c0_1] : memref<8x4x128xf32, #tpu.memory_space<vmem>>, vector<8x4x128xf32>
    %c0_2 = arith.constant 0 : index
    %c0_3 = arith.constant 0 : index
    %c0_4 = arith.constant 0 : index
    %1 = vector.load %arg2[%c0_2, %c0_3, %c0_4] : memref<8x1x128xf32, #tpu.memory_space<vmem>>, vector<8x1x128xf32>
    %2 = vector.broadcast %1 : vector<8x1x128xf32> to vector<8x4x128xf32>
    %3 = arith.addf %0, %2 : vector<8x4x128xf32>
    %c0_5 = arith.constant 0 : index
    %c0_6 = arith.constant 0 : index
    %c0_7 = arith.constant 0 : index
    %4 = vector.load %arg3[%c0_5, %c0_6, %c0_7] : memref<8x4x128xf32, #tpu.memory_space<vmem>>, vector<8x4x128xf32>
    tpu.vector_store %arg3[%c0_5, %c0_6, %c0_7], %3 {strides = array<i32>} : memref<8x4x128xf32, #tpu.memory_space<vmem>>, vector<8x4x128xf32>,
    return
  }
  func.func @transform_0(%arg0: i32) -> (i32, i32, i32) {
    %c0_i32 = arith.constant 0 : i32
    %c0_i32_0 = arith.constant 0 : i32
    %c0_i32_1 = arith.constant 0 : i32
    return %arg0, %c0_i32, %c0_i32_0 : i32, i32, i32
  }
  func.func @transform_1(%arg0: i32) -> (i32, i32, i32) {
    %c0_i32 = arith.constant 0 : i32
    %c0_i32_0 = arith.constant 0 : i32
    %c0_i32_1 = arith.constant 0 : i32
    return %arg0, %c0_i32, %c0_i32_0 : i32, i32, i32
  }
  func.func @transform_2(%arg0: i32) -> (i32, i32, i32) {
    %c0_i32 = arith.constant 0 : i32
    %c0_i32_0 = arith.constant 0 : i32
    %c0_i32_1 = arith.constant 0 : i32
    return %arg0, %c0_i32, %c0_i32_0 : i32, i32, i32
  }
}

</mosaic_0001>

<bundles_post_ra>
// kernel: tpu_custom_call.1
= control target key start
LH: loop header
LB: loop body
LE: loop exit
PB: predicated region body
PF: predicated region fallthrough
CT: control target
= control target key end

     0   :  { %7 = vsyncpa [#allocation3], 0  ;;  %s292_s0 = inlined_call_operand.hbm [shape: f32[8,4,128], index: 0, kind: input, shape index: {}]   ;;  %s293_s1 = inlined_call_operand.hbm [shape: f32[8,1,128], index: 1, kind: input, shape index: {}]   ;;  %s294_s2 = inlined_call_operand.hbm [shape: f32[8,4,128], index: 2, kind: output, shape index: {}]  }
   0x1   :  { %8 = vsyncpa [#allocation6], 0 }
   0x2   :  { %9 = vsyncpa [#allocation4], 0  ;;  %s225_s9 = smov [#allocation2]   ;;  %s153_s13 = scalar_lea.hbm %s292_s0, 512 }
   0x3   :  { %s15_s10 = sshll.u32 %s225_s9, 4  ;;  %p154_p0 = scmp.ne.s32.totalorder %s292_s0, %s153_s13  ;;  %s16_s10 = int_to_ptr.vmem [resolvable:$true] %s15_s10 }
   0x4   :  { %p157_p1 = scmp.lt.u32.totalorder %s153_s13, %s292_s0 }
   0x6   :  { %p159_p2 = pnand %p157_p1, %p154_p0 }
   0x8   :  { %162 = shalt.err (!%p159_p2)
}
   0x9   :  { %s163_s18 = scalar_lea.vmem %s16_s10, 512  ;;  %p168_p4 = scmp.lt.s32.totalorder %s16_s10, %s16_s10 }
   0xa   :  { %p164_p3 = scmp.ne.s32.totalorder %s16_s10, %s163_s18  ;;  %p169_p5 = scmp.lt.s32.totalorder %s163_s18, %s163_s18 }
   0xc   :  { %p170_p6 = por %p169_p5, %p168_p4 }
   0xe   :  { %p171_p7 = pnand %p170_p6, %p164_p3 }
  0x10   :  { %174 = shalt.err (!%p171_p7)
}
  0x11   :  { %s226_s19 = smov 64   ;;  %s227_s20 = smov 4  }
  0x12   :  { %21 = dma.hbm_to_vmem [thread:$0]  %s292_s0, 512, %s16_s10, [#allocation3], %s226_s19, %s226_s19, %s227_s20  }
  0x13   :  { %s228_s23 = smov [#allocation5]   ;;  %s175_s27 = scalar_lea.hbm %s293_s1, 128 }
  0x14   :  { %s27_s24 = sshll.u32 %s228_s23, 4  ;;  %p176_p8 = scmp.ne.s32.totalorder %s293_s1, %s175_s27  ;;  %s28_s24 = int_to_ptr.vmem [resolvable:$true] %s27_s24 }
  0x15   :  { %p179_p9 = scmp.lt.u32.totalorder %s175_s27, %s293_s1 }
  0x17   :  { %p181_p10 = pnand %p179_p9, %p176_p8 }
  0x19   :  { %184 = shalt.err (!%p181_p10)
}
  0x1a   :  { %s185_s4 = scalar_lea.vmem %s28_s24, 128  ;;  %p190_p12 = scmp.lt.s32.totalorder %s28_s24, %s28_s24 }
  0x1b   :  { %p186_p11 = scmp.ne.s32.totalorder %s28_s24, %s185_s4  ;;  %p191_p13 = scmp.lt.s32.totalorder %s185_s4, %s185_s4 }
  0x1d   :  { %p192_p0 = por %p191_p13, %p190_p12 }
  0x1f   :  { %p193_p1 = pnand %p192_p0, %p186_p11 }
  0x21   :  { %196 = shalt.err (!%p193_p1)
}
  0x22   :  { %s229_s0 = smov 16   ;;  %s230_s5 = smov 1  }
  0x23   :  { %33 = dma.hbm_to_vmem [thread:$0]  %s293_s1, 128, %s28_s24, [#allocation6], %s229_s0, %s229_s0, %s230_s5  }
  0x24   :  { %219 = dma.done.wait [#allocation3], 512  }
  0x25   :  { %220 = vsyncadd [#allocation3], 4294966784 }
  0x26   :  { %221 = dma.done.wait [#allocation6], 128  }
  0x27   :  { %222 = vsyncadd [#allocation6], 4294967168  ;;  %s231_s8 = smov [#allocation7]   ;;  %v40_v0 = vld [vmem:[#allocation2] sm:$0xf] }
  0x28   :  { %s274_s9 = sshll.u32 %s231_s8, 4  ;;  %v138_v1 = vld [vmem:[#allocation5] ss:$0 sm:$0xff]  ;;  %v41_v2 = vld [vmem:[#allocation2 + $0x4] sm:$0xf]  ;;  %s126_s9 = int_to_ptr.vmem [resolvable:$true] %s274_s9 }
  0x29   :  { %v104_v3 = vadd.f32 %v138_v1, %v40_v0  ;;  %v139_v4 = vld [vmem:[#allocation5 + $0x1] ss:$0 sm:$0xff]  ;;  %v42_v5 = vld [vmem:[#allocation2 + $0x8] sm:$0xf]  ;;  %v140_v6 = vld [vmem:[#allocation5 + $0x2] ss:$0 sm:$0xff]  ;;  %p202_p3 = scmp.lt.s32.totalorder %s126_s9, %s126_s9 }
  0x2a   :  { %v105_v7 = vadd.f32 %v139_v4, %v41_v2  ;;  %v106_v8 = vadd.f32 %v140_v6, %v42_v5  ;;  %v43_v9 = vld [vmem:[#allocation2 + $0xc] sm:$0xf]  ;;  %v141_v10 = vld [vmem:[#allocation5 + $0x3] ss:$0 sm:$0xff]  ;;  %v44_v11 = vld [vmem:[#allocation2 + $0x10] sm:$0xf] }
  0x2b   :  { %112 = vst [vmem:[#allocation7] sm:$0xf] %v104_v3  ;;  %v107_v12 = vadd.f32 %v141_v10, %v43_v9  ;;  %v142_v13 = vld [vmem:[#allocation5 + $0x4] ss:$0 sm:$0xff]  ;;  %v45_v14 = vld [vmem:[#allocation2 + $0x14] sm:$0xf] }
  0x2c   :  { %v143_v15 = vld [vmem:[#allocation5 + $0x5] ss:$0 sm:$0xff]  ;;  %113 = vst [vmem:[#allocation7 + $0x4] sm:$0xf] %v105_v7  ;;  %114 = vst [vmem:[#allocation7 + $0x8] sm:$0xf] %v106_v8  ;;  %v108_v16 = vadd.f32 %v142_v13, %v44_v11 }
  0x2d   :  { %v109_v17 = vadd.f32 %v143_v15, %v45_v14  ;;  %v46_v18 = vld [vmem:[#allocation2 + $0x18] sm:$0xf]  ;;  %v144_v19 = vld [vmem:[#allocation5 + $0x6] ss:$0 sm:$0xff]  ;;  %v47_v20 = vld [vmem:[#allocation2 + $0x1c] sm:$0xf] }
  0x2e   :  { %115 = vst [vmem:[#allocation7 + $0xc] sm:$0xf] %v107_v12  ;;  %v110_v21 = vadd.f32 %v144_v19, %v46_v18  ;;  %v145_v22 = vld [vmem:[#allocation5 + $0x7] ss:$0 sm:$0xff]  ;;  %116 = vst [vmem:[#allocation7 + $0x10] sm:$0xf] %v108_v16 }
  0x2f   :  { %117 = vst [vmem:[#allocation7 + $0x14] sm:$0xf] %v109_v17  ;;  %v111_v23 = vadd.f32 %v145_v22, %v47_v20  ;;  %s197_s1 = scalar_lea.vmem %s126_s9, 512 }
  0x30   :  { %118 = vst [vmem:[#allocation7 + $0x18] sm:$0xf] %v110_v21  ;;  %p198_p2 = scmp.ne.s32.totalorder %s126_s9, %s197_s1  ;;  %p203_p4 = scmp.lt.s32.totalorder %s197_s1, %s197_s1 }
  0x31   :  { %119 = vst [vmem:[#allocation7 + $0x1c] sm:$0xf] %v111_v23 }
  0x32   :  { %p204_p5 = por %p203_p4, %p202_p3 }
  0x34   :  { %p205_p6 = pnand %p204_p5, %p198_p2 }
  0x36   :  { %208 = shalt.err (!%p205_p6)
}
  0x37   :  { %s209_s12 = scalar_lea.hbm %s294_s2, 512 }
  0x38   :  { %p210_p7 = scmp.ne.s32.totalorder %s294_s2, %s209_s12  ;;  %p213_p8 = scmp.lt.u32.totalorder %s209_s12, %s294_s2 }
  0x3a   :  { %p215_p9 = pnand %p213_p8, %p210_p7 }
  0x3c   :  { %218 = shalt.err (!%p215_p9)
}
  0x3d   :  { %131 = dma.vmem_to_hbm [thread:$0]  %s126_s9, 512, %s294_s2, [#allocation4], %s226_s19, %s226_s19, %s227_s20  }
  0x3e   :  { %223 = dma.done.wait [#allocation4], 512  }
  0x3f   :  { %224 = vsyncadd [#allocation4], 4294966784 }
  0x40   :  { %135 = vsyncpa [#allocation3], 1 }
  0x41   :  { %136 = vsyncpa [#allocation6], 1 }
  0x42   :  { %137 = vsyncpa [#allocation4], 1 }

</bundles_post_ra>
